<compile_context>
chip_gen: v5e
topology: v5e:2x2
jax: 0.10.0
libtpu: 0.0.40
codegen_flags: <defaults>
</compile_context>

<pallas_src>
import functools

import jax
import jax.numpy as jnp
from jax import lax
from jax.experimental import pallas as pl
from jax.experimental.pallas import tpu as pltpu


def _round_up(x, m):
    return ((x + m - 1) // m) * m


def _pick_tile(n, target, align):
    """Tile size (multiple of `align`, ~<= target) that minimizes padding and
    gives >=2 grid steps when the extent allows it (v7x has 2 TensorCores)."""
    n_al = _round_up(max(n, 1), align)
    steps = pl.cdiv(n_al, target)
    if steps == 1 and n_al >= 2 * align:
        steps = 2
    return _round_up(pl.cdiv(n_al, steps), align)


# ----------------------------------------------------------------------------
# Kernel 1: fused encoder + heads (one node tile per grid step)
#   h                    = relu(X @ W1 + b1)
#   head                 = h @ [Wmu | pad | Wsg | pad] + [bmu | 0 | bsg | 0]
#   out[:, :L_pad]       = head[:, :L_pad]                      (mu + pad)
#   out[:, L_pad:]       = elu(head[:, L_pad:]) + 1 + 1e-14     (sigma + pad)
# ----------------------------------------------------------------------------
def _encode_head_kernel(x_ref, w1_ref, b1_ref, wh_ref, bh_ref, out_ref, *, L_pad):
    h = jnp.dot(x_ref[...], w1_ref[...],
                preferred_element_type=jnp.float32) + b1_ref[...]
    h = jnp.maximum(h, 0.0)                          # ReLU
    h = h.astype(wh_ref.dtype)                       # no-op on the f32 path
    head = jnp.dot(h, wh_ref[...],
                   preferred_element_type=jnp.float32) + bh_ref[...]

    # mu / sigma split sits on a 128-lane boundary -> free slices.
    mu_half = head[:, :L_pad]
    sg_half = head[:, L_pad:]
    # ELU with an overflow-safe dead branch (exp argument clamped to <= 0).
    elu = jnp.where(sg_half > 0, sg_half,
                    jnp.exp(jnp.minimum(sg_half, 0.0)) - 1.0)
    out_ref[:, :L_pad] = mu_half
    out_ref[:, L_pad:] = elu + 1.0 + 1e-14


def encode_and_heads(X, W1, b1, Wmu, bmu, Wsg, bsg, *,
                     tile_n=1024, matmul_dtype=jnp.float32):
    N, D = X.shape
    H = W1.shape[1]
    L = Wmu.shape[1]
    L_pad = _round_up(L, 128)      # per-head lane-dense width
    W2 = 2 * L_pad

    # Fuse the two heads into one (H, 2*L_pad) weight / (1, 2*L_pad) bias,
    # zero-padding each head's columns to a 128-lane multiple.
    Whead = jnp.zeros((H, W2), jnp.float32)
    Whead = Whead.at[:, :L].set(Wmu)
    Whead = Whead.at[:, L_pad:L_pad + L].set(Wsg)
    bhead = jnp.zeros((1, W2), jnp.float32)
    bhead = bhead.at[0, :L].set(bmu)
    bhead = bhead.at[0, L_pad:L_pad + L].set(bsg)

    # Cap the node tile so the double-buffered X block stays ~8 MiB.
    rows_cap = max(8, ((8 * 1024 * 1024) // max(D * 4, 1)) // 8 * 8)
    tile_n = _pick_tile(N, min(tile_n, rows_cap), 8)
    N_pad = _round_up(N, tile_n)
    Xp = X if N_pad == N else jnp.pad(X, ((0, N_pad - N), (0, 0)))

    Xc = Xp.astype(matmul_dtype)
    W1c = W1.astype(matmul_dtype)
    Wheadc = Whead.astype(matmul_dtype)

    grid = (N_pad // tile_n,)
    inv = lambda shape: pl.BlockSpec(shape, lambda i: (0, 0))  # grid-invariant

    out = pl.pallas_call(
        functools.partial(_encode_head_kernel, L_pad=L_pad),
        out_shape=jax.ShapeDtypeStruct((N_pad, W2), jnp.float32),
        grid_spec=pltpu.PrefetchScalarGridSpec(
            num_scalar_prefetch=0,
            grid=grid,
            in_specs=[pl.BlockSpec((tile_n, D), lambda i: (i, 0)),
                      inv((D, H)), inv((1, H)),
                      inv((H, W2)), inv((1, W2))],
            out_specs=pl.BlockSpec((tile_n, W2), lambda i: (i, 0)),
        ),
        compiler_params=pltpu.CompilerParams(
            dimension_semantics=("parallel",),
            vmem_limit_bytes=48 * 1024 * 1024),
    )(Xc, W1c, b1.reshape(1, H).astype(jnp.float32), Wheadc, bhead)

    mu = out[:N, :L]
    sigma = out[:N, L_pad:L_pad + L]
    return mu, sigma


# ----------------------------------------------------------------------------
# Kernel 2: symmetric KL between diagonal Gaussians, edges on the sublane axis,
# latent dim (L) on the lane axis.  Inputs are the gathered (tile_b, L) blocks
# (no wrapper-side transposes); output is a (tile_b, 1) column per tile.
# ----------------------------------------------------------------------------
def _kl_kernel(mu_i_ref, sig_i_ref, mu_j_ref, sig_j_ref, kl_ref, *, L):
    mu_i = mu_i_ref[...]
    sig_i = sig_i_ref[...]
    mu_j = mu_j_ref[...]
    sig_j = sig_j_ref[...]

    def recip(x):
        # EUP approximate reciprocal + 2 Newton-Raphson steps: frees the VALU
        # divide sequence while staying many orders below the 1e-4 tolerance.
        r = pl.reciprocal(x, approx=True)
        r = r * (2.0 - x * r)
        r = r * (2.0 - x * r)
        return r

    inv_si = recip(sig_i)
    inv_sj = recip(sig_j)
    r_ij = sig_j * inv_si
    diff2 = (mu_i - mu_j) ** 2

    trace_ij = jnp.sum(r_ij, axis=1, keepdims=True)
    trace_ji = jnp.sum(sig_i * inv_sj, axis=1, keepdims=True)
    # Single log slab; logdet_ji = -logdet_ij.  The per-direction deviation
    # from the reference's log(r + 1e-14) is O(1e-14 * (r + 1/r)), and whenever
    # that is non-negligible the matching trace term is ~r >> |logdet|, so the
    # returned symmetric KL matches to ~1e-14 relative.
    logdet_ij = jnp.sum(jnp.log(r_ij + 1e-14), axis=1, keepdims=True)
    logdet_ji = -logdet_ij
    md_ij = jnp.sum(diff2 * inv_si, axis=1, keepdims=True)
    md_ji = jnp.sum(diff2 * inv_sj, axis=1, keepdims=True)

    kl_ij = 0.5 * (trace_ij + md_ij - L - logdet_ij)
    kl_ji = 0.5 * (trace_ji + md_ji - L - logdet_ji)
    kl_ref[...] = 0.5 * (kl_ij + kl_ji)


def kl_distance(mu_i, sigma_i, mu_j, sigma_j, *, tile_b=4096):
    B, L = mu_i.shape
    # Cap the edge tile so one double-buffered input block stays ~4 MiB
    # (4 inputs x 2 buffers -> ~32 MiB worst case, inside the 48 MiB limit).
    rows_cap = max(8, ((4 * 1024 * 1024) // max(L * 4, 1)) // 8 * 8)
    tile_b = _pick_tile(B, min(tile_b, rows_cap), 8)
    B_pad = _round_up(B, tile_b)

    def pad_rows(a, fill):
        if B_pad == B:
            return a
        return jnp.pad(a, ((0, B_pad - B), (0, 0)), constant_values=fill)

    mu_i_p = pad_rows(mu_i, 0.0)
    mu_j_p = pad_rows(mu_j, 0.0)
    sig_i_p = pad_rows(sigma_i, 1.0)   # padded edges -> KL == 0, no inf/NaN
    sig_j_p = pad_rows(sigma_j, 1.0)

    grid = (B_pad // tile_b,)
    blk = pl.BlockSpec((tile_b, L), lambda i: (i, 0))
    out = pl.pallas_call(
        functools.partial(_kl_kernel, L=float(L)),
        out_shape=jax.ShapeDtypeStruct((B_pad, 1), jnp.float32),
        grid_spec=pltpu.PrefetchScalarGridSpec(
            num_scalar_prefetch=0,
            grid=grid,
            in_specs=[blk, blk, blk, blk],
            out_specs=pl.BlockSpec((tile_b, 1), lambda i: (i, 0)),
        ),
        compiler_params=pltpu.CompilerParams(
            dimension_semantics=("parallel",),
            vmem_limit_bytes=48 * 1024 * 1024),
    )(mu_i_p, sig_i_p, mu_j_p, sig_j_p)
    return out[:B, 0]


# ----------------------------------------------------------------------------
# GLACE forward (mirrors the PyTorch module's forward())
# ----------------------------------------------------------------------------
@functools.partial(jax.jit, static_argnames=("proximity",))
def glace_forward(X_dense, params, u_i, u_j, proximity="first-order"):
    enc = params["encoder"]
    mu, sigma = encode_and_heads(X_dense, enc["W1"], enc["b1"],
                                 enc["Wmu"], enc["bmu"],
                                 enc["Wsg"], enc["bsg"])
    ctx_mu = None
    ctx_sigma = None
    if proximity == "second-order":
        ctx = params["context_encoder"]
        ctx_mu, ctx_sigma = encode_and_heads(X_dense, ctx["W1"], ctx["b1"],
                                             ctx["Wmu"], ctx["bmu"],
                                             ctx["Wsg"], ctx["bsg"])

    # Edge-endpoint gather (XLA gather; see TODO(synk) at the top of the file).
    mu_i = jnp.take(mu, u_i, axis=0)
    sigma_i = jnp.take(sigma, u_i, axis=0)
    if proximity == "first-order":
        mu_j = jnp.take(mu, u_j, axis=0)
        sigma_j = jnp.take(sigma, u_j, axis=0)
    else:
        mu_j = jnp.take(ctx_mu, u_j, axis=0)
        sigma_j = jnp.take(ctx_sigma, u_j, axis=0)

    kl = kl_distance(mu_i, sigma_i, mu_j, sigma_j)
    return kl, mu, sigma, (ctx_mu if proximity == "second-order" else None)


# ----------------------------------------------------------------------------
# Pure-JAX reference (correctness sanity check, matches the PyTorch module)
# ----------------------------------------------------------------------------
def _ref_encode(X, p):
    hi = lax.Precision.HIGHEST   # true-f32 reference matmuls
    h = jnp.maximum(jnp.dot(X, p["W1"], precision=hi) + p["b1"], 0.0)
    mu = jnp.dot(h, p["Wmu"], precision=hi) + p["bmu"]
    ls = jnp.dot(h, p["Wsg"], precision=hi) + p["bsg"]
    sigma = jnp.where(ls > 0, ls, jnp.exp(jnp.minimum(ls, 0.0)) - 1.0) + 1.0 + 1e-14
    return mu, sigma


def _ref_forward(X, params, u_i, u_j, proximity):
    mu, sigma = _ref_encode(X, params["encoder"])
    if proximity == "second-order":
        cmu, csig = _ref_encode(X, params["context_encoder"])
        mu_j, sig_j = cmu[u_j], csig[u_j]
    else:
        mu_j, sig_j = mu[u_j], sigma[u_j]
    mu_i, sig_i = mu[u_i], sigma[u_i]
    L = mu.shape[1]

    def kl(mi, si, mj, sj):
        r = sj / si
        return 0.5 * (jnp.sum(r, 1) + jnp.sum((mi - mj) ** 2 / si, 1)
                      - L - jnp.sum(jnp.log(r + 1e-14), 1))

    return (0.5 * (kl(mu_i, sig_i, mu_j, sig_j) + kl(mu_j, sig_j, mu_i, sig_i)),
            mu, sigma)


# ----------------------------------------------------------------------------
def _init_head_params(key, D, H, L):
    k1, k2, k3, k4, k5, k6 = jax.random.split(key, 6)
    s1 = 1.0 / jnp.sqrt(D)
    s2 = 1.0 / jnp.sqrt(H)
    return {
        "W1": jax.random.uniform(k1, (D, H), jnp.float32, -s1, s1),
        "b1": jax.random.uniform(k2, (H,), jnp.float32, -s1, s1),
        "Wmu": jax.random.uniform(k3, (H, L), jnp.float32, -s2, s2),
        "bmu": jax.random.uniform(k4, (L,), jnp.float32, -s2, s2),
        "Wsg": jax.random.uniform(k5, (H, L), jnp.float32, -s2, s2),
        "bsg": jax.random.uniform(k6, (L,), jnp.float32, -s2, s2),
    }


if __name__ == "__main__":
    # Small shapes consistent with the module:
    #   N nodes, D input features, hidden = 512 (n_hidden in the module),
    #   L = embedding_dim, B sampled edges.
    N, D, H, L, B = 16, 32, 512, 32, 8

    key = jax.random.PRNGKey(0)
    kx, ke, kc, ki, kj = jax.random.split(key, 5)

    # Dense version of the (sparse in PyTorch) feature matrix X.
    X_dense = jax.random.uniform(kx, (N, D), jnp.float32)

    params = {
        "encoder": _init_head_params(ke, D, H, L),
        "context_encoder": _init_head_params(kc, D, H, L),
    }

    u_i = jax.random.randint(ki, (B,), 0, N)
    u_j = jax.random.randint(kj, (B,), 0, N)

    for proximity in ("first-order", "second-order"):
        kl, mu, sigma, ctx_mu = glace_forward(X_dense, params, u_i, u_j, proximity)
        jax.block_until_ready((kl, mu, sigma))
        if ctx_mu is not None:
            jax.block_until_ready(ctx_mu)
        ref_kl, ref_mu, ref_sigma = _ref_forward(X_dense, params, u_i, u_j, proximity)
        assert jnp.allclose(mu, ref_mu, rtol=1e-4, atol=1e-4)
        assert jnp.allclose(sigma, ref_sigma, rtol=1e-4, atol=1e-4)
        assert jnp.allclose(kl, ref_kl, rtol=1e-4, atol=1e-4), (kl, ref_kl)

    print("KERNEL_OK")
</pallas_src>

<mosaic_0001>
module attributes {stable_mosaic.version = 11 : i64} {
  func.func @_encode_head_kernel(%arg0: i32, %arg1: memref<8x32xf32, #tpu.memory_space<vmem>>, %arg2: memref<32x512xf32, #tpu.memory_space<vmem>>, %arg3: memref<1x512xf32, #tpu.memory_space<vmem>>, %arg4: memref<512x256xf32, #tpu.memory_space<vmem>>, %arg5: memref<1x256xf32, #tpu.memory_space<vmem>>, %arg6: memref<8x256xf32, #tpu.memory_space<vmem>>) attributes {dimension_semantics = [#tpu.dimension_semantics<parallel>], iteration_bounds = array<i64: 2>, scalar_prefetch = 0 : i64, scratch_operands = 0 : i64, tpu.core_type = #tpu.core_type<tc>, window_params = [{transform_indices = @transform_0, window_bounds = array<i64: 8, 32>}, {pipeline_mode = #tpu.pipeline_mode<synchronous>, transform_indices = @transform_1, window_bounds = array<i64: 32, 512>}, {pipeline_mode = #tpu.pipeline_mode<synchronous>, transform_indices = @transform_2, window_bounds = array<i64: 1, 512>}, {pipeline_mode = #tpu.pipeline_mode<synchronous>, transform_indices = @transform_3, window_bounds = array<i64: 512, 256>}, {pipeline_mode = #tpu.pipeline_mode<synchronous>, transform_indices = @transform_4, window_bounds = array<i64: 1, 256>}, {transform_indices = @transform_5, window_bounds = array<i64: 8, 256>}]} {
    %c0 = arith.constant 0 : index
    %c0_0 = arith.constant 0 : index
    %0 = vector.load %arg1[%c0, %c0_0] : memref<8x32xf32, #tpu.memory_space<vmem>>, vector<8x32xf32>
    %c0_1 = arith.constant 0 : index
    %c0_2 = arith.constant 0 : index
    %1 = vector.load %arg2[%c0_1, %c0_2] : memref<32x512xf32, #tpu.memory_space<vmem>>, vector<32x512xf32>
    %cst = arith.constant dense<0.000000e+00> : vector<8x512xf32>
    %2 = tpu.matmul %0, %1, %cst {dimension_numbers = #tpu.dot_dimension_numbers<[1], [0], [0], [1], [0, 0, 1, 1], [], []>} : vector<8x32xf32>, vector<32x512xf32>, vector<8x512xf32> -> vector<8x512xf32>
    %c0_3 = arith.constant 0 : index
    %c0_4 = arith.constant 0 : index
    %3 = vector.load %arg3[%c0_3, %c0_4] : memref<1x512xf32, #tpu.memory_space<vmem>>, vector<1x512xf32>
    %4 = vector.broadcast %3 : vector<1x512xf32> to vector<8x512xf32>
    %5 = arith.addf %2, %4 : vector<8x512xf32>
    %cst_5 = arith.constant 0.000000e+00 : f32
    %6 = vector.broadcast %cst_5 : f32 to vector<8x512xf32>
    %7 = arith.maximumf %5, %6 : vector<8x512xf32>
    %c0_6 = arith.constant 0 : index
    %c0_7 = arith.constant 0 : index
    %8 = vector.load %arg4[%c0_6, %c0_7] : memref<512x256xf32, #tpu.memory_space<vmem>>, vector<512x256xf32>
    %cst_8 = arith.constant dense<0.000000e+00> : vector<8x256xf32>
    %9 = tpu.matmul %7, %8, %cst_8 {dimension_numbers = #tpu.dot_dimension_numbers<[1], [0], [0], [1], [0, 0, 1, 1], [], []>} : vector<8x512xf32>, vector<512x256xf32>, vector<8x256xf32> -> vector<8x256xf32>
    %c0_9 = arith.constant 0 : index
    %c0_10 = arith.constant 0 : index
    %10 = vector.load %arg5[%c0_9, %c0_10] : memref<1x256xf32, #tpu.memory_space<vmem>>, vector<1x256xf32>
    %11 = vector.broadcast %10 : vector<1x256xf32> to vector<8x256xf32>
    %12 = arith.addf %9, %11 : vector<8x256xf32>
    %13 = vector.extract_strided_slice %12 {offsets = [0, 0], sizes = [8, 128], strides = [1, 1]} : vector<8x256xf32> to vector<8x128xf32>
    %14 = vector.extract_strided_slice %12 {offsets = [0, 128], sizes = [8, 128], strides = [1, 1]} : vector<8x256xf32> to vector<8x128xf32>
    %cst_11 = arith.constant 0.000000e+00 : f32
    %15 = vector.broadcast %cst_11 : f32 to vector<8x128xf32>
    %16 = arith.cmpf ogt, %14, %15 : vector<8x128xf32>
    %cst_12 = arith.constant 0.000000e+00 : f32
    %17 = vector.broadcast %cst_12 : f32 to vector<8x128xf32>
    %18 = arith.minimumf %14, %17 : vector<8x128xf32>
    %19 = math.exp %18 : vector<8x128xf32>
    %cst_13 = arith.constant 1.000000e+00 : f32
    %20 = vector.broadcast %cst_13 : f32 to vector<8x128xf32>
    %21 = arith.subf %19, %20 : vector<8x128xf32>
    %22 = arith.select %16, %14, %21 : vector<8x128xi1>, vector<8x128xf32>
    %c0_14 = arith.constant 0 : index
    %c0_15 = arith.constant 0 : index
    %23 = vector.load %arg6[%c0_14, %c0_15] : memref<8x256xf32, #tpu.memory_space<vmem>>, vector<8x128xf32>
    tpu.vector_store %arg6[%c0_14, %c0_15], %13 {strides = array<i32>} : memref<8x256xf32, #tpu.memory_space<vmem>>, vector<8x128xf32>,
    %cst_16 = arith.constant 1.000000e+00 : f32
    %24 = vector.broadcast %cst_16 : f32 to vector<8x128xf32>
    %25 = arith.addf %22, %24 : vector<8x128xf32>
    %cst_17 = arith.constant 9.99999982E-15 : f32
    %26 = vector.broadcast %cst_17 : f32 to vector<8x128xf32>
    %27 = arith.addf %25, %26 : vector<8x128xf32>
    %c0_18 = arith.constant 0 : index
    %c128 = arith.constant 128 : index
    %28 = vector.load %arg6[%c0_18, %c128] : memref<8x256xf32, #tpu.memory_space<vmem>>, vector<8x128xf32>
    tpu.vector_store %arg6[%c0_18, %c128], %27 {strides = array<i32>} : memref<8x256xf32, #tpu.memory_space<vmem>>, vector<8x128xf32>,
    return
  }
  func.func @transform_0(%arg0: i32) -> (i32, i32) {
    %c0_i32 = arith.constant 0 : i32
    %c0_i32_0 = arith.constant 0 : i32
    return %arg0, %c0_i32 : i32, i32
  }
  func.func @transform_1(%arg0: i32) -> (i32, i32) {
    %c0_i32 = arith.constant 0 : i32
    %c0_i32_0 = arith.constant 0 : i32
    %c0_i32_1 = arith.constant 0 : i32
    return %c0_i32, %c0_i32_0 : i32, i32
  }
  func.func @transform_2(%arg0: i32) -> (i32, i32) {
    %c0_i32 = arith.constant 0 : i32
    %c0_i32_0 = arith.constant 0 : i32
    %c0_i32_1 = arith.constant 0 : i32
    return %c0_i32, %c0_i32_0 : i32, i32
  }
  func.func @transform_3(%arg0: i32) -> (i32, i32) {
    %c0_i32 = arith.constant 0 : i32
    %c0_i32_0 = arith.constant 0 : i32
    %c0_i32_1 = arith.constant 0 : i32
    return %c0_i32, %c0_i32_0 : i32, i32
  }
  func.func @transform_4(%arg0: i32) -> (i32, i32) {
    %c0_i32 = arith.constant 0 : i32
    %c0_i32_0 = arith.constant 0 : i32
    %c0_i32_1 = arith.constant 0 : i32
    return %c0_i32, %c0_i32_0 : i32, i32
  }
  func.func @transform_5(%arg0: i32) -> (i32, i32) {
    %c0_i32 = arith.constant 0 : i32
    %c0_i32_0 = arith.constant 0 : i32
    return %arg0, %c0_i32 : i32, i32
  }
}

module attributes {stable_mosaic.version = 11 : i64} {
  func.func @_kl_kernel(%arg0: i32, %arg1: memref<8x32xf32, #tpu.memory_space<vmem>>, %arg2: memref<8x32xf32, #tpu.memory_space<vmem>>, %arg3: memref<8x32xf32, #tpu.memory_space<vmem>>, %arg4: memref<8x32xf32, #tpu.memory_space<vmem>>, %arg5: memref<8x1xf32, #tpu.memory_space<vmem>>) attributes {dimension_semantics = [#tpu.dimension_semantics<parallel>], iteration_bounds = array<i64: 1>, scalar_prefetch = 0 : i64, scratch_operands = 0 : i64, tpu.core_type = #tpu.core_type<tc>, window_params = [{transform_indices = @transform_0, window_bounds = array<i64: 8, 32>}, {transform_indices = @transform_1, window_bounds = array<i64: 8, 32>}, {transform_indices = @transform_2, window_bounds = array<i64: 8, 32>}, {transform_indices = @transform_3, window_bounds = array<i64: 8, 32>}, {transform_indices = @transform_4, window_bounds = array<i64: 8, 1>}]} {
    %c0 = arith.constant 0 : index
    %c0_0 = arith.constant 0 : index
    %0 = vector.load %arg1[%c0, %c0_0] : memref<8x32xf32, #tpu.memory_space<vmem>>, vector<8x32xf32>
    %c0_1 = arith.constant 0 : index
    %c0_2 = arith.constant 0 : index
    %1 = vector.load %arg2[%c0_1, %c0_2] : memref<8x32xf32, #tpu.memory_space<vmem>>, vector<8x32xf32>
    %c0_3 = arith.constant 0 : index
    %c0_4 = arith.constant 0 : index
    %2 = vector.load %arg3[%c0_3, %c0_4] : memref<8x32xf32, #tpu.memory_space<vmem>>, vector<8x32xf32>
    %c0_5 = arith.constant 0 : index
    %c0_6 = arith.constant 0 : index
    %3 = vector.load %arg4[%c0_5, %c0_6] : memref<8x32xf32, #tpu.memory_space<vmem>>, vector<8x32xf32>
    %4 = tpu.reciprocal %1 {approx = true} : vector<8x32xf32> -> vector<8x32xf32>
    %5 = arith.mulf %1, %4 : vector<8x32xf32>
    %cst = arith.constant 2.000000e+00 : f32
    %6 = vector.broadcast %cst : f32 to vector<8x32xf32>
    %7 = arith.subf %6, %5 : vector<8x32xf32>
    %8 = arith.mulf %4, %7 : vector<8x32xf32>
    %9 = arith.mulf %1, %8 : vector<8x32xf32>
    %cst_7 = arith.constant 2.000000e+00 : f32
    %10 = vector.broadcast %cst_7 : f32 to vector<8x32xf32>
    %11 = arith.subf %10, %9 : vector<8x32xf32>
    %12 = arith.mulf %8, %11 : vector<8x32xf32>
    %13 = tpu.reciprocal %3 {approx = true} : vector<8x32xf32> -> vector<8x32xf32>
    %14 = arith.mulf %3, %13 : vector<8x32xf32>
    %cst_8 = arith.constant 2.000000e+00 : f32
    %15 = vector.broadcast %cst_8 : f32 to vector<8x32xf32>
    %16 = arith.subf %15, %14 : vector<8x32xf32>
    %17 = arith.mulf %13, %16 : vector<8x32xf32>
    %18 = arith.mulf %3, %17 : vector<8x32xf32>
    %cst_9 = arith.constant 2.000000e+00 : f32
    %19 = vector.broadcast %cst_9 : f32 to vector<8x32xf32>
    %20 = arith.subf %19, %18 : vector<8x32xf32>
    %21 = arith.mulf %17, %20 : vector<8x32xf32>
    %22 = arith.mulf %3, %12 : vector<8x32xf32>
    %23 = arith.subf %0, %2 : vector<8x32xf32>
    %24 = arith.mulf %23, %23 : vector<8x32xf32>
    %cst_10 = arith.constant dense<0.000000e+00> : vector<8xf32>
    %25 = vector.multi_reduction <add>, %22, %cst_10 [1] : vector<8x32xf32> to vector<8xf32>
    %26 = vector.shape_cast %25 : vector<8xf32> to vector<8x1xf32>
    %27 = arith.mulf %1, %21 : vector<8x32xf32>
    %cst_11 = arith.constant dense<0.000000e+00> : vector<8xf32>
    %28 = vector.multi_reduction <add>, %27, %cst_11 [1] : vector<8x32xf32> to vector<8xf32>
    %29 = vector.shape_cast %28 : vector<8xf32> to vector<8x1xf32>
    %cst_12 = arith.constant 9.99999982E-15 : f32
    %30 = vector.broadcast %cst_12 : f32 to vector<8x32xf32>
    %31 = arith.addf %22, %30 : vector<8x32xf32>
    %32 = math.log %31 : vector<8x32xf32>
    %cst_13 = arith.constant dense<0.000000e+00> : vector<8xf32>
    %33 = vector.multi_reduction <add>, %32, %cst_13 [1] : vector<8x32xf32> to vector<8xf32>
    %34 = vector.shape_cast %33 : vector<8xf32> to vector<8x1xf32>
    %cst_14 = arith.constant 0.000000e+00 : f32
    %35 = vector.broadcast %cst_14 : f32 to vector<8x1xf32>
    %36 = arith.subf %35, %34 : vector<8x1xf32>
    %37 = arith.mulf %24, %12 : vector<8x32xf32>
    %cst_15 = arith.constant dense<0.000000e+00> : vector<8xf32>
    %38 = vector.multi_reduction <add>, %37, %cst_15 [1] : vector<8x32xf32> to vector<8xf32>
    %39 = vector.shape_cast %38 : vector<8xf32> to vector<8x1xf32>
    %40 = arith.mulf %24, %21 : vector<8x32xf32>
    %cst_16 = arith.constant dense<0.000000e+00> : vector<8xf32>
    %41 = vector.multi_reduction <add>, %40, %cst_16 [1] : vector<8x32xf32> to vector<8xf32>
    %42 = vector.shape_cast %41 : vector<8xf32> to vector<8x1xf32>
    %43 = arith.addf %26, %39 : vector<8x1xf32>
    %cst_17 = arith.constant 3.200000e+01 : f32
    %44 = vector.broadcast %cst_17 : f32 to vector<8x1xf32>
    %45 = arith.subf %43, %44 : vector<8x1xf32>
    %46 = arith.subf %45, %34 : vector<8x1xf32>
    %cst_18 = arith.constant 5.000000e-01 : f32
    %47 = vector.broadcast %cst_18 : f32 to vector<8x1xf32>
    %48 = arith.mulf %47, %46 : vector<8x1xf32>
    %49 = arith.addf %29, %42 : vector<8x1xf32>
    %cst_19 = arith.constant 3.200000e+01 : f32
    %50 = vector.broadcast %cst_19 : f32 to vector<8x1xf32>
    %51 = arith.subf %49, %50 : vector<8x1xf32>
    %52 = arith.subf %51, %36 : vector<8x1xf32>
    %cst_20 = arith.constant 5.000000e-01 : f32
    %53 = vector.broadcast %cst_20 : f32 to vector<8x1xf32>
    %54 = arith.mulf %53, %52 : vector<8x1xf32>
    %55 = arith.addf %48, %54 : vector<8x1xf32>
    %cst_21 = arith.constant 5.000000e-01 : f32
    %56 = vector.broadcast %cst_21 : f32 to vector<8x1xf32>
    %57 = arith.mulf %56, %55 : vector<8x1xf32>
    %c0_22 = arith.constant 0 : index
    %c0_23 = arith.constant 0 : index
    %58 = vector.load %arg5[%c0_22, %c0_23] : memref<8x1xf32, #tpu.memory_space<vmem>>, vector<8x1xf32>
    tpu.vector_store %arg5[%c0_22, %c0_23], %57 {strides = array<i32>} : memref<8x1xf32, #tpu.memory_space<vmem>>, vector<8x1xf32>,
    return
  }
  func.func @transform_0(%arg0: i32) -> (i32, i32) {
    %c0_i32 = arith.constant 0 : i32
    %c0_i32_0 = arith.constant 0 : i32
    return %arg0, %c0_i32 : i32, i32
  }
  func.func @transform_1(%arg0: i32) -> (i32, i32) {
    %c0_i32 = arith.constant 0 : i32
    %c0_i32_0 = arith.constant 0 : i32
    return %arg0, %c0_i32 : i32, i32
  }
  func.func @transform_2(%arg0: i32) -> (i32, i32) {
    %c0_i32 = arith.constant 0 : i32
    %c0_i32_0 = arith.constant 0 : i32
    return %arg0, %c0_i32 : i32, i32
  }
  func.func @transform_3(%arg0: i32) -> (i32, i32) {
    %c0_i32 = arith.constant 0 : i32
    %c0_i32_0 = arith.constant 0 : i32
    return %arg0, %c0_i32 : i32, i32
  }
  func.func @transform_4(%arg0: i32) -> (i32, i32) {
    %c0_i32 = arith.constant 0 : i32
    %c0_i32_0 = arith.constant 0 : i32
    return %arg0, %c0_i32 : i32, i32
  }
}

</mosaic_0001>

<bundles_post_ra>
// kernel: glace_forward.3
= control target key start
LH: loop header
LB: loop body
LE: loop exit
PB: predicated region body
PF: predicated region fallthrough
CT: control target
= control target key end

     0   :  { %vm38_vm0 = vcmask 261120   ;;  %vm71_vm1 = vcmask 7168   ;;  %s130_s1 = inlined_call_operand.vmem [shape: f32[8,32], index: 1, kind: input, shape index: {}]   ;;  %s131_s3 = inlined_call_operand.vmem [shape: f32[8,32], index: 3, kind: input, shape index: {}]   ;;  %s132_s0 = inlined_call_operand.vmem [shape: f32[8,32], index: 0, kind: input, shape index: {}]   ;;  %s133_s2 = inlined_call_operand.vmem [shape: f32[8,32], index: 2, kind: input, shape index: {}]   ;;  %s134_s4 = inlined_call_operand.vmem [shape: f32[8,1], index: 4, kind: output, shape index: {}]  }
   0x1   :  { %v18_v0 = vld [vmem:[%s130_s1] sm:$0xff] }
   0x2   :  { %v20_v1 = vld [vmem:[%s131_s3] sm:$0xff]  ;;  %79 = vrcp.f32 %v18_v0 }
   0x3   :  { %81 = vrcp.f32 %v20_v1  ;;  %v17_v5 = vld [vmem:[%s132_s0] sm:$0xff] }
   0x4   :  { %v19_v6 = vld [vmem:[%s133_s2] sm:$0xff] }
   0x5   :  { %v36_v11 = vsub.f32 %v17_v5, %v19_v6 }
   0x7   :  { %v37_v16 = vmul.f32 %v36_v11, %v36_v11 }
   0x8   :  { %v80_v2 = vpop.eup %79 }
   0x9   :  { %v82_v3 = vpop.eup %81  ;;  %v22_v4 = vmul.f32 %v80_v2, %v18_v0 }
   0xa   :  { %v29_v7 = vmul.f32 %v82_v3, %v20_v1 }
   0xb   :  { %v23_v8 = vsub.f32 2.0, %v22_v4 }
   0xc   :  { %v30_v9 = vsub.f32 2.0, %v29_v7 }
   0xd   :  { %v24_v10 = vmul.f32 %v80_v2, %v23_v8 }
   0xe   :  { %v31_v12 = vmul.f32 %v82_v3, %v30_v9 }
   0xf   :  { %v25_v13 = vmul.f32 %v24_v10, %v18_v0 }
  0x10   :  { %v32_v14 = vmul.f32 %v31_v12, %v20_v1 }
  0x11   :  { %v26_v15 = vsub.f32 2.0, %v25_v13 }
  0x12   :  { %v33_v17 = vsub.f32 2.0, %v32_v14 }
  0x13   :  { %v27_v18 = vmul.f32 %v26_v15, %v24_v10 }
  0x14   :  { %v34_v21 = vmul.f32 %v33_v17, %v31_v12 }
  0x15   :  { %v35_v19 = vmul.f32 %v27_v18, %v20_v1  ;;  %v53_v20 = vmul.f32 %v37_v16, %v27_v18 }
  0x16   :  { %v42_v25 = vmul.f32 %v34_v21, %v18_v0  ;;  %v57_v26 = vmul.f32 %v37_v16, %v34_v21 }
  0x17   :  { %v39_v22 = vsel %vm38_vm0, %v35_v19, 0.0  ;;  %v46_v23 = vadd.f32 1e-14, %v35_v19  ;;  %v54_v24 = vsel %vm38_vm0, %v53_v20, 0.0 }
  0x18   :  { %40 = vadd.xlane.f32.xlu0 %v39_v22  ;;  %55 = vadd.xlane.f32.xlu1 %v54_v24  ;;  %v43_v27 = vsel %vm38_vm0, %v42_v25, 0.0  ;;  %v58_v28 = vsel %vm38_vm0, %v57_v26, 0.0 }
  0x19   :  { %83 = vlog2.f32 %v46_v23 }
  0x1f   :  { %v84_v29 = vpop.eup %83 }
  0x20   :  { %44 = vadd.xlane.f32.xlu0 %v43_v27  ;;  %59 = vadd.xlane.f32.xlu1 %v58_v28  ;;  %v48_v30 = vmul.f32 0.6931472, %v84_v29 }
  0x22   :  { %v49_v31 = vsel %vm38_vm0, %v48_v30, 0.0 }
  0x23   :  { %50 = vadd.xlane.f32.xlu2 %v49_v31 }
  0x8b   :  { %v41_v32 = vpop.xlane.xlu0 %40  ;;  %v56_v33 = vpop.xlane.xlu1 %55 }
  0x8c   :  { %v61_v34 = vadd.f32 %v56_v33, %v41_v32 }
  0x8e   :  { %v77_v38 = vadd.f32 -32.0, %v61_v34 }
  0x93   :  { %v45_v35 = vpop.xlane.xlu0 %44  ;;  %v60_v36 = vpop.xlane.xlu1 %59 }
  0x94   :  { %v65_v37 = vadd.f32 %v60_v36, %v45_v35 }
  0x96   :  { %v78_v39 = vadd.f32 -32.0, %v65_v37  ;;  %v51_v40 = vpop.xlane.xlu2 %50 }
  0x97   :  { %v52_v41 = vsub.f32 0.0, %v51_v40  ;;  %v63_v42 = vsub.f32 %v77_v38, %v51_v40 }
  0x99   :  { %v67_v43 = vsub.f32 %v78_v39, %v52_v41  ;;  %v64_v44 = vmul.f32 0.5, %v63_v42 }
  0x9b   :  { %v68_v45 = vmul.f32 0.5, %v67_v43 }
  0x9d   :  { %v69_v46 = vadd.f32 %v68_v45, %v64_v44 }
  0x9f   :  { %v70_v47 = vmul.f32 0.5, %v69_v46 }
  0xa1   :  { %72 = vst.msk [vmem:[%s134_s4] sm:$0xff] %vm71_vm1, %v70_v47 }

// kernel: glace_forward.2
= control target key start
LH: loop header
LB: loop body
LE: loop exit
PB: predicated region body
PF: predicated region fallthrough
CT: control target
= control target key end

     0   :  { %s760_s18 = smov 0   ;;  %s1223_s0 = inlined_call_operand.vmem [shape: f32[16,32], index: 0, kind: input, shape index: {}]   ;;  %s1224_s1 = inlined_call_operand.vmem [shape: f32[32,512], index: 1, kind: input, shape index: {}]   ;;  %s1225_s2 = inlined_call_operand.vmem [shape: f32[1,512], index: 2, kind: input, shape index: {}]   ;;  %s1226_s3 = inlined_call_operand.vmem [shape: f32[512,256], index: 3, kind: input, shape index: {}]   ;;  %s1227_s4 = inlined_call_operand.vmem [shape: f32[1,256], index: 4, kind: input, shape index: {}]   ;;  %s1228_s5 = inlined_call_operand.vmem [shape: f32[16,256], index: 5, kind: output, shape index: {}]  }
   0x1 LB: > { %s696_s19 = sadd.s32 4294967295, %s728_s18   ;;  %p700_p0 = scmp.ge.s32.totalorder %s728_s18, 1  ;;  %s728_s18 = sphi %s760_s18, %s15_s18  }
   0x2   : > { %p186_p1 = scmp.lt.s32.totalorder %s728_s18, 3 }
   0x4   : > { %p187_p2 = pnand %p700_p0, %p186_p1 }
   0x5   : > { %p213_p3 = scmp.lt.s32.totalorder (!%p187_p2), %s696_s19, 1 }
   0x6   : > { %190 = sbr.rel (%p187_p2) target bundleno = 319 (0x13f), region = 40 }
   0xb   : > { %v235_v0 = vld [vmem:[%s1224_s1 + $0x60] sm:$0xff]  ;;  %v237_v1 = vld [vmem:[%s1224_s1 + $0x70] sm:$0xff]  ;;  %v238_v2 = vld [vmem:[%s1224_s1 + $0x78] sm:$0xff]  ;;  %s1230_s19 = smov (!%p213_p3, %s696_s19), 1  ;;  %vm249_vm0 = vcmask 261120  }
   0xc   : > { %265 = vmatpush.msra.mxu0 %v235_v0  ;;  %305 = vmatpush.msra.mxu2 %v237_v1  ;;  %v231_v3 = vld [vmem:[%s1224_s1 + $0x40] sm:$0xff]  ;;  %v236_v4 = vld [vmem:[%s1224_s1 + $0x68] sm:$0xff]  ;;  %v233_v5 = vld [vmem:[%s1224_s1 + $0x50] sm:$0xff]  ;;  %s701_s25 = sshll.u32 %s1230_s19, 3  ;;  %s711_s15 = sshll.u32 %s1230_s19, 4 }
   0xd   : > { %325 = vmatpush.msra.mxu3 %v238_v2  ;;  %285 = vmatpush.msra.mxu1 %v236_v4  ;;  %v234_v6 = vld [vmem:[%s1224_s1 + $0x58] sm:$0xff]  ;;  %v227_v7 = vld [vmem:[%s1224_s1 + $0x20] sm:$0xff]  ;;  %v232_v8 = vld [vmem:[%s1224_s1 + $0x48] sm:$0xff]  ;;  %s216_s30 = scalar_lea.vmem %s1223_s0, %s701_s25  ;;  %s221_s20 = scalar_lea.vmem %s1228_s5, %s711_s15 }
   0xe   : > { %266 = vmatpush.msra.mxu0 %v231_v3  ;;  %306 = vmatpush.msra.mxu2 %v233_v5  ;;  %v229_v9 = vld [vmem:[%s1224_s1 + $0x30] sm:$0xff]  ;;  %v230_v10 = vld [vmem:[%s1224_s1 + $0x38] sm:$0xff]  ;;  %v223_v11 = vld [vmem:[%s1224_s1] sm:$0xff] }
   0xf   : > { %326 = vmatpush.msra.mxu3 %v234_v6  ;;  %286 = vmatpush.msra.mxu1 %v232_v8  ;;  %v228_v12 = vld [vmem:[%s1224_s1 + $0x28] sm:$0xff]  ;;  %v225_v13 = vld [vmem:[%s1224_s1 + $0x10] sm:$0xff]  ;;  %v226_v14 = vld [vmem:[%s1224_s1 + $0x18] sm:$0xff] }
  0x10   : > { %267 = vmatpush.msra.mxu0 %v227_v7  ;;  %307 = vmatpush.msra.mxu2 %v229_v9  ;;  %v222_v15 = vld [vmem:[%s216_s30] sm:$0xff]  ;;  %v224_v16 = vld [vmem:[%s1224_s1 + $0x8] sm:$0xff]  ;;  %v367_v17 = vld [vmem:[%s1226_s3 + $0xf0] sm:$0xff] }
  0x11   : > { %327 = vmatpush.msra.mxu3 %v230_v10  ;;  %287 = vmatpush.msra.mxu1 %v228_v12  ;;  %v431_v18 = vld [vmem:[%s1226_s3 + $0x2f0] sm:$0xff]  ;;  %v365_v19 = vld [vmem:[%s1226_s3 + $0xe0] sm:$0xff] }
  0x12   : > { %268 = vmatpush.msra.mxu0 %v223_v11  ;;  %308 = vmatpush.msra.mxu2 %v225_v13  ;;  %v399_v20 = vld [vmem:[%s1226_s3 + $0x1f0] sm:$0xff]  ;;  %v429_v22 = vld [vmem:[%s1226_s3 + $0x2e0] sm:$0xff]  ;;  %v368_v13 = vld [vmem:[%s1226_s3 + $0xf8] sm:$0xff] }
  0x13   : > { %328 = vmatpush.msra.mxu3 %v226_v14  ;;  %704 = vmatmul.msk.f32.vlgmr.msra.gmra.mxu0 %vm249_vm0, %v222_v15  ;;  %v463_v21 = vld [vmem:[%s1226_s3 + $0x3f0] sm:$0xff]  ;;  %v397_v24 = vld [vmem:[%s1226_s3 + $0x1e0] sm:$0xff] }
  0x14   : > { %706 = vmatmul.msk.f32.vlgmr.msra.gmra.mxu2 %vm249_vm0, %v222_v15  ;;  %707 = vmatmul.msk.f32.vlgmr.msra.gmra.mxu3 %vm249_vm0, %v222_v15  ;;  %v363_v23 = vld [vmem:[%s1226_s3 + $0xd0] sm:$0xff]  ;;  %v461_v25 = vld [vmem:[%s1226_s3 + $0x3e0] sm:$0xff] }
  0x15   : > { %288 = vmatpush.msra.mxu1 %v224_v16  ;;  %471 = vmatpush.msrb.mxu0 %v367_v17  ;;  %v427_v26 = vld [vmem:[%s1226_s3 + $0x2d0] sm:$0xff]  ;;  %v361_v27 = vld [vmem:[%s1226_s3 + $0xc0] sm:$0xff]  ;;  %v366_v17 = vld [vmem:[%s1226_s3 + $0xe8] sm:$0xff] }
  0x16   : > { %705 = vmatmul.msk.f32.vlgmr.msra.gmra.mxu1 %vm249_vm0, %v222_v15  ;;  %511 = vmatpush.msrb.mxu2 %v431_v18  ;;  %v395_v28 = vld [vmem:[%s1226_s3 + $0x1d0] sm:$0xff]  ;;  %v425_v30 = vld [vmem:[%s1226_s3 + $0x2c0] sm:$0xff]  ;;  %v400_v18 = vld [vmem:[%s1226_s3 + $0x1f8] sm:$0xff] }
  0x17   : > { %472 = vmatpush.msrb.mxu0 %v365_v19  ;;  %491 = vmatpush.msrb.mxu1 %v399_v20  ;;  %v459_v29 = vld [vmem:[%s1226_s3 + $0x3d0] sm:$0xff]  ;;  %v393_v32 = vld [vmem:[%s1226_s3 + $0x1c0] sm:$0xff]  ;;  %v432_v20 = vld [vmem:[%s1226_s3 + $0x2f8] sm:$0xff] }
  0x18   : > { %531 = vmatpush.msrb.mxu3 %v463_v21  ;;  %512 = vmatpush.msrb.mxu2 %v429_v22  ;;  %v359_v31 = vld [vmem:[%s1226_s3 + $0xb0] sm:$0xff]  ;;  %v457_v33 = vld [vmem:[%s1226_s3 + $0x3c0] sm:$0xff]  ;;  %v364_v21 = vld [vmem:[%s1226_s3 + $0xd8] sm:$0xff] }
  0x19   : > { %473 = vmatpush.msrb.mxu0 %v363_v23  ;;  %492 = vmatpush.msrb.mxu1 %v397_v24  ;;  %v423_v34 = vld [vmem:[%s1226_s3 + $0x2b0] sm:$0xff]  ;;  %v357_v35 = vld [vmem:[%s1226_s3 + $0xa0] sm:$0xff]  ;;  %v398_v22 = vld [vmem:[%s1226_s3 + $0x1e8] sm:$0xff] }
  0x1a   : > { %532 = vmatpush.msrb.mxu3 %v461_v25  ;;  %513 = vmatpush.msrb.mxu2 %v427_v26  ;;  %v391_v36 = vld [vmem:[%s1226_s3 + $0x1b0] sm:$0xff]  ;;  %v421_v38 = vld [vmem:[%s1226_s3 + $0x2a0] sm:$0xff]  ;;  %v464_v23 = vld [vmem:[%s1226_s3 + $0x3f8] sm:$0xff] }
  0x1b   : > { %474 = vmatpush.msrb.mxu0 %v361_v27  ;;  %493 = vmatpush.msrb.mxu1 %v395_v28  ;;  %v455_v37 = vld [vmem:[%s1226_s3 + $0x3b0] sm:$0xff]  ;;  %v389_v40 = vld [vmem:[%s1226_s3 + $0x1a0] sm:$0xff]  ;;  %v430_v24 = vld [vmem:[%s1226_s3 + $0x2e8] sm:$0xff] }
  0x1c   : > { %533 = vmatpush.msrb.mxu3 %v459_v29  ;;  %514 = vmatpush.msrb.mxu2 %v425_v30  ;;  %v355_v39 = vld [vmem:[%s1226_s3 + $0x90] sm:$0xff]  ;;  %v453_v41 = vld [vmem:[%s1226_s3 + $0x3a0] sm:$0xff]  ;;  %v362_v25 = vld [vmem:[%s1226_s3 + $0xc8] sm:$0xff] }
  0x1d   : > { %475 = vmatpush.msrb.mxu0 %v359_v31  ;;  %494 = vmatpush.msrb.mxu1 %v393_v32  ;;  %v419_v42 = vld [vmem:[%s1226_s3 + $0x290] sm:$0xff]  ;;  %v353_v43 = vld [vmem:[%s1226_s3 + $0x80] sm:$0xff]  ;;  %v396_v26 = vld [vmem:[%s1226_s3 + $0x1d8] sm:$0xff] }
  0x1e   : > { %534 = vmatpush.msrb.mxu3 %v457_v33  ;;  %515 = vmatpush.msrb.mxu2 %v423_v34  ;;  %v387_v44 = vld [vmem:[%s1226_s3 + $0x190] sm:$0xff]  ;;  %v417_v46 = vld [vmem:[%s1226_s3 + $0x280] sm:$0xff]  ;;  %v462_v27 = vld [vmem:[%s1226_s3 + $0x3e8] sm:$0xff] }
  0x1f   : > { %476 = vmatpush.msrb.mxu0 %v357_v35  ;;  %495 = vmatpush.msrb.mxu1 %v391_v36  ;;  %v451_v45 = vld [vmem:[%s1226_s3 + $0x390] sm:$0xff]  ;;  %v385_v48 = vld [vmem:[%s1226_s3 + $0x180] sm:$0xff]  ;;  %v428_v28 = vld [vmem:[%s1226_s3 + $0x2d8] sm:$0xff] }
  0x20   : > { %535 = vmatpush.msrb.mxu3 %v455_v37  ;;  %516 = vmatpush.msrb.mxu2 %v421_v38  ;;  %v351_v47 = vld [vmem:[%s1226_s3 + $0x70] sm:$0xff]  ;;  %v449_v49 = vld [vmem:[%s1226_s3 + $0x380] sm:$0xff]  ;;  %v360_v29 = vld [vmem:[%s1226_s3 + $0xb8] sm:$0xff] }
  0x21   : > { %477 = vmatpush.msrb.mxu0 %v355_v39  ;;  %496 = vmatpush.msrb.mxu1 %v389_v40  ;;  %v415_v50 = vld [vmem:[%s1226_s3 + $0x270] sm:$0xff]  ;;  %v349_v51 = vld [vmem:[%s1226_s3 + $0x60] sm:$0xff]  ;;  %v394_v30 = vld [vmem:[%s1226_s3 + $0x1c8] sm:$0xff] }
  0x22   : > { %536 = vmatpush.msrb.mxu3 %v453_v41  ;;  %517 = vmatpush.msrb.mxu2 %v419_v42  ;;  %v383_v52 = vld [vmem:[%s1226_s3 + $0x170] sm:$0xff]  ;;  %v413_v54 = vld [vmem:[%s1226_s3 + $0x260] sm:$0xff]  ;;  %v460_v31 = vld [vmem:[%s1226_s3 + $0x3d8] sm:$0xff] }
  0x23   : > { %478 = vmatpush.msrb.mxu0 %v353_v43  ;;  %497 = vmatpush.msrb.mxu1 %v387_v44  ;;  %v447_v53 = vld [vmem:[%s1226_s3 + $0x370] sm:$0xff]  ;;  %v381_v56 = vld [vmem:[%s1226_s3 + $0x160] sm:$0xff]  ;;  %v426_v32 = vld [vmem:[%s1226_s3 + $0x2c8] sm:$0xff] }
  0x24   : > { %537 = vmatpush.msrb.mxu3 %v451_v45  ;;  %518 = vmatpush.msrb.mxu2 %v417_v46  ;;  %v347_v55 = vld [vmem:[%s1226_s3 + $0x50] sm:$0xff]  ;;  %v445_v57 = vld [vmem:[%s1226_s3 + $0x360] sm:$0xff]  ;;  %v358_v33 = vld [vmem:[%s1226_s3 + $0xa8] sm:$0xff] }
  0x25   : > { %479 = vmatpush.msrb.mxu0 %v351_v47  ;;  %498 = vmatpush.msrb.mxu1 %v385_v48  ;;  %v411_v58 = vld [vmem:[%s1226_s3 + $0x250] sm:$0xff]  ;;  %v345_v59 = vld [vmem:[%s1226_s3 + $0x40] sm:$0xff]  ;;  %v392_v34 = vld [vmem:[%s1226_s3 + $0x1b8] sm:$0xff] }
  0x26   : > { %538 = vmatpush.msrb.mxu3 %v449_v49  ;;  %519 = vmatpush.msrb.mxu2 %v415_v50  ;;  %v379_v60 = vld [vmem:[%s1226_s3 + $0x150] sm:$0xff]  ;;  %v409_v62 = vld [vmem:[%s1226_s3 + $0x240] sm:$0xff]  ;;  %v458_v35 = vld [vmem:[%s1226_s3 + $0x3c8] sm:$0xff] }
  0x27   : > { %480 = vmatpush.msrb.mxu0 %v349_v51  ;;  %499 = vmatpush.msrb.mxu1 %v383_v52  ;;  %v443_v61 = vld [vmem:[%s1226_s3 + $0x350] sm:$0xff]  ;;  %v377_v0 = vld [vmem:[%s1226_s3 + $0x140] sm:$0xff]  ;;  %v424_v36 = vld [vmem:[%s1226_s3 + $0x2b8] sm:$0xff] }
  0x28   : > { %539 = vmatpush.msrb.mxu3 %v447_v53  ;;  %520 = vmatpush.msrb.mxu2 %v413_v54  ;;  %v343_v63 = vld [vmem:[%s1226_s3 + $0x30] sm:$0xff]  ;;  %v441_v1 = vld [vmem:[%s1226_s3 + $0x340] sm:$0xff]  ;;  %v356_v37 = vld [vmem:[%s1226_s3 + $0x98] sm:$0xff] }
  0x29   : > { %481 = vmatpush.msrb.mxu0 %v347_v55  ;;  %500 = vmatpush.msrb.mxu1 %v381_v56  ;;  %v407_v2 = vld [vmem:[%s1226_s3 + $0x230] sm:$0xff]  ;;  %v341_v3 = vld [vmem:[%s1226_s3 + $0x20] sm:$0xff]  ;;  %v390_v38 = vld [vmem:[%s1226_s3 + $0x1a8] sm:$0xff] }
  0x2a   : > { %540 = vmatpush.msrb.mxu3 %v445_v57  ;;  %521 = vmatpush.msrb.mxu2 %v411_v58  ;;  %v375_v4 = vld [vmem:[%s1226_s3 + $0x130] sm:$0xff]  ;;  %v405_v6 = vld [vmem:[%s1226_s3 + $0x220] sm:$0xff]  ;;  %v456_v39 = vld [vmem:[%s1226_s3 + $0x3b8] sm:$0xff] }
  0x2b   : > { %482 = vmatpush.msrb.mxu0 %v345_v59  ;;  %501 = vmatpush.msrb.mxu1 %v379_v60  ;;  %v439_v5 = vld [vmem:[%s1226_s3 + $0x330] sm:$0xff]  ;;  %v373_v8 = vld [vmem:[%s1226_s3 + $0x120] sm:$0xff]  ;;  %v422_v40 = vld [vmem:[%s1226_s3 + $0x2a8] sm:$0xff] }
  0x2c   : > { %541 = vmatpush.msrb.mxu3 %v443_v61  ;;  %522 = vmatpush.msrb.mxu2 %v409_v62  ;;  %v339_v7 = vld [vmem:[%s1226_s3 + $0x10] sm:$0xff]  ;;  %v437_v9 = vld [vmem:[%s1226_s3 + $0x320] sm:$0xff]  ;;  %v354_v41 = vld [vmem:[%s1226_s3 + $0x88] sm:$0xff] }
  0x2d   : > { %483 = vmatpush.msrb.mxu0 %v343_v63  ;;  %502 = vmatpush.msrb.mxu1 %v377_v0  ;;  %v403_v10 = vld [vmem:[%s1226_s3 + $0x210] sm:$0xff]  ;;  %v337_v11 = vld [vmem:[%s1226_s3] sm:$0xff]  ;;  %v388_v42 = vld [vmem:[%s1226_s3 + $0x198] sm:$0xff] }
  0x2e   : > { %542 = vmatpush.msrb.mxu3 %v441_v1  ;;  %523 = vmatpush.msrb.mxu2 %v407_v2  ;;  %v371_v12 = vld [vmem:[%s1226_s3 + $0x110] sm:$0xff]  ;;  %v369_v15 = vld [vmem:[%s1226_s3 + $0x100] sm:$0xff]  ;;  %v454_v43 = vld [vmem:[%s1226_s3 + $0x3a8] sm:$0xff] }
  0x2f   : > { %484 = vmatpush.msrb.mxu0 %v341_v3  ;;  %503 = vmatpush.msrb.mxu1 %v375_v4  ;;  %v435_v14 = vld [vmem:[%s1226_s3 + $0x310] sm:$0xff]  ;;  %v401_v16 = vld [vmem:[%s1226_s3 + $0x200] sm:$0xff]  ;;  %v352_v44 = vld [vmem:[%s1226_s3 + $0x78] sm:$0xff] }
  0x30   : > { %543 = vmatpush.msrb.mxu3 %v439_v5  ;;  %524 = vmatpush.msrb.mxu2 %v405_v6  ;;  %v433_v19 = vld [vmem:[%s1226_s3 + $0x300] sm:$0xff]  ;;  %v386_v45 = vld [vmem:[%s1226_s3 + $0x188] sm:$0xff]  ;;  %v384_v47 = vld [vmem:[%s1226_s3 + $0x178] sm:$0xff] }
  0x31   : > { %485 = vmatpush.msrb.mxu0 %v339_v7  ;;  %504 = vmatpush.msrb.mxu1 %v373_v8  ;;  %v350_v46 = vld [vmem:[%s1226_s3 + $0x68] sm:$0xff]  ;;  %v420_v48 = vld [vmem:[%s1226_s3 + $0x298] sm:$0xff] }
  0x32   : > { %544 = vmatpush.msrb.mxu3 %v437_v9  ;;  %525 = vmatpush.msrb.mxu2 %v403_v10  ;;  %v452_v49 = vld [vmem:[%s1226_s3 + $0x398] sm:$0xff]  ;;  %v382_v51 = vld [vmem:[%s1226_s3 + $0x168] sm:$0xff] }
  0x33   : > { %486 = vmatpush.msrb.mxu0 %v337_v11  ;;  %505 = vmatpush.msrb.mxu1 %v371_v12  ;;  %v348_v50 = vld [vmem:[%s1226_s3 + $0x58] sm:$0xff]  ;;  %v418_v52 = vld [vmem:[%s1226_s3 + $0x288] sm:$0xff] }
  0x34   : > { %545 = vmatpush.msrb.mxu3 %v435_v14  ;;  %526 = vmatpush.msrb.mxu2 %v401_v16  ;;  %v450_v53 = vld [vmem:[%s1226_s3 + $0x388] sm:$0xff]  ;;  %v380_v55 = vld [vmem:[%s1226_s3 + $0x158] sm:$0xff] }
  0x35   : > { %551 = vmatpush.msra.mxu0 %v368_v13  ;;  %506 = vmatpush.msrb.mxu1 %v369_v15  ;;  %v346_v54 = vld [vmem:[%s1226_s3 + $0x48] sm:$0xff]  ;;  %v416_v56 = vld [vmem:[%s1226_s3 + $0x278] sm:$0xff] }
  0x36   : > { %546 = vmatpush.msrb.mxu3 %v433_v19  ;;  %591 = vmatpush.msra.mxu2 %v432_v20  ;;  %v448_v57 = vld [vmem:[%s1226_s3 + $0x378] sm:$0xff]  ;;  %v378_v59 = vld [vmem:[%s1226_s3 + $0x148] sm:$0xff] }
  0x37   : > { %552 = vmatpush.msra.mxu0 %v366_v17  ;;  %571 = vmatpush.msra.mxu1 %v400_v18  ;;  %v344_v58 = vld [vmem:[%s1226_s3 + $0x38] sm:$0xff]  ;;  %v414_v60 = vld [vmem:[%s1226_s3 + $0x268] sm:$0xff]  ;;  %v239_v17 = vld [vmem:[%s1225_s2] sm:$0xf] }
  0x38   : > { %611 = vmatpush.msra.mxu3 %v464_v23  ;;  %592 = vmatpush.msra.mxu2 %v430_v24  ;;  %v446_v61 = vld [vmem:[%s1226_s3 + $0x368] sm:$0xff]  ;;  %v376_v63 = vld [vmem:[%s1226_s3 + $0x138] sm:$0xff]  ;;  %v241_v18 = vperm.slane %v239_v17, 0  ;;  %v242_v20 = vperm.slane %v239_v17, 1 }
  0x39   : > { %553 = vmatpush.msra.mxu0 %v364_v21  ;;  %572 = vmatpush.msra.mxu1 %v398_v22  ;;  %v342_v62 = vld [vmem:[%s1226_s3 + $0x28] sm:$0xff]  ;;  %v412_v0 = vld [vmem:[%s1226_s3 + $0x258] sm:$0xff] }
  0x3a   : > { %612 = vmatpush.msra.mxu3 %v462_v27  ;;  %593 = vmatpush.msra.mxu2 %v428_v28  ;;  %v444_v1 = vld [vmem:[%s1226_s3 + $0x358] sm:$0xff]  ;;  %v374_v3 = vld [vmem:[%s1226_s3 + $0x128] sm:$0xff] }
  0x3b   : > { %554 = vmatpush.msra.mxu0 %v362_v25  ;;  %573 = vmatpush.msra.mxu1 %v396_v26  ;;  %v340_v2 = vld [vmem:[%s1226_s3 + $0x18] sm:$0xff]  ;;  %v410_v4 = vld [vmem:[%s1226_s3 + $0x248] sm:$0xff]  ;;  %v243_v25 = vperm.slane %v239_v17, 2  ;;  %v244_v26 = vperm.slane %v239_v17, 3 }
  0x3c   : > { %613 = vmatpush.msra.mxu3 %v460_v31  ;;  %594 = vmatpush.msra.mxu2 %v426_v32  ;;  %v442_v5 = vld [vmem:[%s1226_s3 + $0x348] sm:$0xff]  ;;  %v372_v7 = vld [vmem:[%s1226_s3 + $0x118] sm:$0xff] }
  0x3d   : > { %555 = vmatpush.msra.mxu0 %v360_v29  ;;  %574 = vmatpush.msra.mxu1 %v394_v30  ;;  %v338_v6 = vld [vmem:[%s1226_s3 + $0x8] sm:$0xff]  ;;  %v408_v8 = vld [vmem:[%s1226_s3 + $0x238] sm:$0xff] }
  0x3e   : > { %614 = vmatpush.msra.mxu3 %v458_v35  ;;  %595 = vmatpush.msra.mxu2 %v424_v36  ;;  %v440_v9 = vld [vmem:[%s1226_s3 + $0x338] sm:$0xff]  ;;  %v370_v10 = vld [vmem:[%s1226_s3 + $0x108] sm:$0xff] }
  0x3f   : > { %556 = vmatpush.msra.mxu0 %v358_v33  ;;  %575 = vmatpush.msra.mxu1 %v392_v34  ;;  %v406_v11 = vld [vmem:[%s1226_s3 + $0x228] sm:$0xff]  ;;  %v404_v13 = vld [vmem:[%s1226_s3 + $0x218] sm:$0xff]  ;;  %v465_v34 = vld [vmem:[%s1227_s4] sm:$0x3] }
  0x40   : > { %615 = vmatpush.msra.mxu3 %v456_v39  ;;  %596 = vmatpush.msra.mxu2 %v422_v40  ;;  %v438_v12 = vld [vmem:[%s1226_s3 + $0x328] sm:$0xff]  ;;  %v436_v14 = vld [vmem:[%s1226_s3 + $0x318] sm:$0xff]  ;;  %v467_v35 = vperm.slane %v465_v34, 0  ;;  %v468_v40 = vperm.slane %v465_v34, 1 }
  0x41   : > { %557 = vmatpush.msra.mxu0 %v356_v37  ;;  %576 = vmatpush.msra.mxu1 %v390_v38  ;;  %v402_v15 = vld [vmem:[%s1226_s3 + $0x208] sm:$0xff] }
  0x42   : > { %616 = vmatpush.msra.mxu3 %v454_v43  ;;  %597 = vmatpush.msra.mxu2 %v420_v48  ;;  %v434_v16 = vld [vmem:[%s1226_s3 + $0x308] sm:$0xff] }
  0x43   : > { %558 = vmatpush.msra.mxu0 %v354_v41  ;;  %577 = vmatpush.msra.mxu1 %v388_v42 }
  0x44   : > { %617 = vmatpush.msra.mxu3 %v452_v49  ;;  %598 = vmatpush.msra.mxu2 %v418_v52 }
  0x45   : > { %559 = vmatpush.msra.mxu0 %v352_v44  ;;  %578 = vmatpush.msra.mxu1 %v386_v45 }
  0x46   : > { %618 = vmatpush.msra.mxu3 %v450_v53  ;;  %599 = vmatpush.msra.mxu2 %v416_v56 }
  0x47   : > { %560 = vmatpush.msra.mxu0 %v350_v46  ;;  %579 = vmatpush.msra.mxu1 %v384_v47 }
  0x48   : > { %619 = vmatpush.msra.mxu3 %v448_v57  ;;  %600 = vmatpush.msra.mxu2 %v414_v60 }
  0x49   : > { %561 = vmatpush.msra.mxu0 %v348_v50  ;;  %580 = vmatpush.msra.mxu1 %v382_v51 }
  0x4a   : > { %620 = vmatpush.msra.mxu3 %v446_v61  ;;  %601 = vmatpush.msra.mxu2 %v412_v0 }
  0x4b   : > { %562 = vmatpush.msra.mxu0 %v346_v54  ;;  %581 = vmatpush.msra.mxu1 %v380_v55 }
  0x4c   : > { %621 = vmatpush.msra.mxu3 %v444_v1  ;;  %602 = vmatpush.msra.mxu2 %v410_v4 }
  0x4d   : > { %563 = vmatpush.msra.mxu0 %v344_v58  ;;  %582 = vmatpush.msra.mxu1 %v378_v59 }
  0x4e   : > { %622 = vmatpush.msra.mxu3 %v442_v5  ;;  %603 = vmatpush.msra.mxu2 %v408_v8 }
  0x4f   : > { %564 = vmatpush.msra.mxu0 %v342_v62  ;;  %583 = vmatpush.msra.mxu1 %v376_v63 }
  0x50   : > { %623 = vmatpush.msra.mxu3 %v440_v9  ;;  %604 = vmatpush.msra.mxu2 %v406_v11 }
  0x51   : > { %565 = vmatpush.msra.mxu0 %v340_v2  ;;  %584 = vmatpush.msra.mxu1 %v374_v3 }
  0x52   : > { %624 = vmatpush.msra.mxu3 %v438_v12  ;;  %605 = vmatpush.msra.mxu2 %v404_v13 }
  0x53   : > { %566 = vmatpush.msra.mxu0 %v338_v6  ;;  %585 = vmatpush.msra.mxu1 %v372_v7 }
  0x54   : > { %625 = vmatpush.msra.mxu3 %v436_v14  ;;  %606 = vmatpush.msra.mxu2 %v402_v15 }
  0x55   : > { %586 = vmatpush.msra.mxu1 %v370_v10 }
  0x56   : > { %626 = vmatpush.msra.mxu3 %v434_v16 }
  0x90   : > { %v270_v19 = vpop.f32.mrf.mxu0 }
  0x91   : > { %v271_v21 = vadd.f32 %v270_v19, %v241_v18 }
  0x93   : > { %v333_v22 = vmax.f32 %v271_v21, 0.0  ;;  %v290_v23 = vpop.f32.mrf.mxu1 }
  0x94   : > { %v291_v24 = vadd.f32 %v290_v23, %v242_v20 }
  0x95   : > { %487 = vmatmul.f32.vlgmr.msrb.gmra.mxu0 %v333_v22 }
  0x96   : > { %v334_v27 = vmax.f32 %v291_v24, 0.0 }
  0x97   : > { %v310_v28 = vpop.f32.mrf.mxu2  ;;  %v330_v29 = vpop.f32.mrf.mxu3 }
  0x98   : > { %v311_v30 = vadd.f32 %v310_v28, %v243_v25  ;;  %v331_v31 = vadd.f32 %v330_v29, %v244_v26  ;;  %507 = vmatmul.f32.vlgmr.msrb.gmra.mxu1 %v334_v27 }
  0x9a   : > { %v335_v32 = vmax.f32 %v311_v30, 0.0  ;;  %v336_v33 = vmax.f32 %v331_v31, 0.0 }
  0x9c   : > { %527 = vmatmul.f32.vlgmr.msrb.gmra.mxu2 %v335_v32  ;;  %547 = vmatmul.f32.vlgmr.msrb.gmra.mxu3 %v336_v33 }
  0x9d   : > { %567 = vmatmul.f32.vlgmr.msra.gmra.mxu0 %v333_v22 }
  0xa0   : > { %587 = vmatmul.f32.vlgmr.msra.gmra.mxu1 %v334_v27 }
  0xa4   : > { %607 = vmatmul.f32.vlgmr.msra.gmra.mxu2 %v335_v32  ;;  %627 = vmatmul.f32.vlgmr.msra.gmra.mxu3 %v336_v33 }
 0x112   : > { %v488_v36 = vpop.f32.mrf.mxu0 }
 0x113   : > { %v489_v37 = vadd.f32 %v488_v36, %v467_v35 }
 0x115   : > { %v508_v38 = vpop.f32.mrf.mxu1 }
 0x116   : > { %v509_v39 = vadd.f32 %v508_v38, %v489_v37 }
 0x11a   : > { %v568_v41 = vpop.f32.mrf.mxu0 }
 0x11b   : > { %v569_v45 = vadd.f32 %v568_v41, %v468_v40 }
 0x11d   : > { %v588_v47 = vpop.f32.mrf.mxu1 }
 0x11e   : > { %v589_v48 = vadd.f32 %v588_v47, %v569_v45 }
 0x11f   : > { %v528_v42 = vpop.f32.mrf.mxu2  ;;  %v548_v43 = vpop.f32.mrf.mxu3 }
 0x120   : > { %v529_v44 = vadd.f32 %v528_v42, %v509_v39 }
 0x122   : > { %v549_v46 = vadd.f32 %v548_v43, %v529_v44 }
 0x124   : > { %637 = vst [vmem:[%s221_s20] sm:$0xff] %v549_v46 }
 0x127   : > { %v608_v49 = vpop.f32.mrf.mxu2  ;;  %v628_v51 = vpop.f32.mrf.mxu3 }
 0x128   : > { %v609_v50 = vadd.f32 %v608_v49, %v589_v48 }
 0x12a   : > { %v629_v52 = vadd.f32 %v628_v51, %v609_v50 }
 0x12c   : > { %v632_v53 = vmin.f32 %v629_v52, 0.0  ;;  %vm631_vm1 = vcmp.gt.f32.partialorder %v629_v52, 0.0 }
 0x12e   : > { %v633_v54 = vmul.f32 1.442695, %v632_v53 }
 0x130   : > { %720 = vpow2.f32 %v633_v54 }
 0x136   : > { %v721_v55 = vpop.eup %720 }
 0x137   : > { %v708_v56 = vadd.f32 -1.0, %v721_v55 }
 0x139   : > { %v636_v57 = vsel %vm631_vm1, %v629_v52, %v708_v56 }
 0x13a   : > { %v638_v58 = vadd.f32 1.0, %v636_v57 }
 0x13c   : > { %v639_v59 = vadd.f32 1e-14, %v638_v58 }
 0x13e   : > { %640 = vst [vmem:[%s221_s20 + $0x8] sm:$0xff] %v639_v59 }
 0x13f PF: > { %s15_s18 = sadd.s32 1, %s728_s18  }
 0x140   : > { %p12_p4 = scmp.ge.s32.totalorder %s15_s18, 4  }
 0x142   :  { %14 = sbr.rel (!%p12_p4) target bundleno = 1 (0x1), region = 70 }

</bundles_post_ra>
